<compile_context>
chip_gen: v5e
topology: v5e:2x2
jax: 0.10.0
libtpu: 0.0.40
codegen_flags: <defaults>
</compile_context>

<pallas_src>
import jax
import jax.numpy as jnp
from jax.experimental import pallas as pl
from jax.experimental.pallas import tpu as pltpu


def _model_part_kernel(x_ref, wt_ref, b_ref, o_ref, acc_ref):
    # x_ref:  [tn, thw, C]  input slab, native dtype (lane axis = C)
    # wt_ref: [C, K]        classifier weight^T, pre-scaled by 1/HW, f32
    # b_ref:  [1, K]        classifier bias, f32
    # o_ref:  [tn, K]       logits (f32)
    # acc_ref:[tn, C]       f32 running sum over HW (VMEM scratch)
    j = pl.program_id(1)

    @pl.when(j == 0)
    def _():
        acc_ref[...] = jnp.zeros_like(acc_ref)

    # Partial global-average-pool: accumulate the sum over this HW slab in f32.
    acc_ref[...] += jnp.sum(x_ref[...].astype(jnp.float32), axis=1)

    @pl.when(j == pl.num_programs(1) - 1)
    def _():
        pooled = acc_ref[...]                         # [tn, C]; 1/HW folded into wt
        logits = jnp.dot(pooled, wt_ref[...],
                         preferred_element_type=jnp.float32) + b_ref[...]
        o_ref[...] = logits.astype(o_ref.dtype)


def model_part_forward(x, weight, bias):
    """x: [N, C, H, W] (NCHW), weight: [K, C], bias: [K] -> logits [N, K] (f32)."""
    n, c, h, w = x.shape
    k = weight.shape[0]
    hw = h * w

    # Channels-last, lane-dense layout for the kernel: [N, HW, C] (plain JAX glue).
    x_cl = jnp.transpose(x, (0, 2, 3, 1)).reshape(n, hw, c)

    # Fold the 1/HW averaging scale into the transposed classifier weight (host side).
    wt = weight.T.astype(jnp.float32) * jnp.float32(1.0 / hw)   # [C, K]
    b2 = bias.reshape(1, k).astype(jnp.float32)                 # [1, K]

    # ---- tile selection ----
    # Batch tile: must satisfy the (8,128) rule on the [tn, K] output block,
    # i.e. a multiple of 8 or the full N.
    if n % 8 == 0:
        tn = min(n, 8)
    else:
        tn = n

    # HW tile: multiple of 8 that divides HW, capped so one x buffer stays small
    # enough that double-buffering fits comfortably in scoped VMEM on v7x/v6e/v5e.
    itemsize = jnp.dtype(x.dtype).itemsize
    budget_per_buf = 4 * 1024 * 1024                            # bytes
    max_thw = max(8, budget_per_buf // max(1, tn * c * itemsize))
    thw = hw                                                    # fallback: full HW block
    for cand in (1024, 512, 256, 128, 64, 32, 16, 8):
        if cand <= hw and cand <= max_thw and hw % cand == 0:
            thw = cand
            break

    grid = (n // tn, hw // thw)                                 # HW (reduction) axis last

    cost = pl.CostEstimate(
        flops=2 * n * c * k + n * c * hw,
        transcendentals=0,
        bytes_accessed=n * c * hw * itemsize + c * k * 4 + k * 4 + n * k * 4,
    )

    out = pl.pallas_call(
        _model_part_kernel,
        out_shape=jax.ShapeDtypeStruct((n, k), jnp.float32),
        grid_spec=pltpu.PrefetchScalarGridSpec(
            num_scalar_prefetch=0,
            grid=grid,
            in_specs=[
                pl.BlockSpec((tn, thw, c), lambda i, j: (i, j, 0)),   # x slab
                pl.BlockSpec((c, k), lambda i, j: (0, 0)),            # weight^T (resident)
                pl.BlockSpec((1, k), lambda i, j: (0, 0)),            # bias (resident)
            ],
            out_specs=pl.BlockSpec((tn, k), lambda i, j: (i, 0)),
            scratch_shapes=[pltpu.VMEM((tn, c), jnp.float32)],
        ),
        compiler_params=pltpu.CompilerParams(
            dimension_semantics=("parallel", "arbitrary")),
        cost_estimate=cost,
    )(x_cl, wt, b2)
    return out


if __name__ == "__main__":
    # Small shapes consistent with the forward pass (exercises >1 HW tile).
    N, C, H, W = 2, 32, 32, 32
    K = 8  # num classes

    key = jax.random.PRNGKey(0)
    kx, kw, kb = jax.random.split(key, 3)

    x = jax.random.normal(kx, (N, C, H, W), dtype=jnp.float32)
    # Deterministic synthetic classifier parameters (Linear(C -> K)).
    weight = jax.random.normal(kw, (K, C), dtype=jnp.float32) * 0.05
    bias = jax.random.normal(kb, (K,), dtype=jnp.float32) * 0.05

    out = model_part_forward(x, weight, bias)
    out = jax.block_until_ready(out)

    # Pure-JAX reference of the same semantics.
    ref = jnp.mean(x, axis=(2, 3)) @ weight.T + bias
    assert out.shape == (N, K)
    assert jnp.allclose(out, ref, atol=1e-4, rtol=1e-4)

    print("KERNEL_OK")
</pallas_src>

<mosaic_0001>
module attributes {stable_mosaic.version = 11 : i64} {
  func.func @_model_part_kernel(%arg0: i32, %arg1: i32, %arg2: memref<2x1024x32xf32, #tpu.memory_space<vmem>>, %arg3: memref<32x8xf32, #tpu.memory_space<vmem>>, %arg4: memref<1x8xf32, #tpu.memory_space<vmem>>, %arg5: memref<2x8xf32, #tpu.memory_space<vmem>>, %arg6: memref<2x32xf32, #tpu.memory_space<vmem>>) attributes {dimension_semantics = [#tpu.dimension_semantics<parallel>, #tpu.dimension_semantics<arbitrary>], iteration_bounds = array<i64: 1, 1>, scalar_prefetch = 0 : i64, scratch_operands = 1 : i64, tpu.core_type = #tpu.core_type<tc>, window_params = [{transform_indices = @transform_0, window_bounds = array<i64: 2, 1024, 32>}, {pipeline_mode = #tpu.pipeline_mode<synchronous>, transform_indices = @transform_1, window_bounds = array<i64: 32, 8>}, {pipeline_mode = #tpu.pipeline_mode<synchronous>, transform_indices = @transform_2, window_bounds = array<i64: 1, 8>}, {transform_indices = @transform_3, window_bounds = array<i64: 2, 8>}]} {
    %c0_i32 = arith.constant 0 : i32
    %0 = arith.cmpi eq, %arg1, %c0_i32 : i32
    %1 = arith.extui %0 : i1 to i32
    %c0_i32_0 = arith.constant 0 : i32
    %2 = arith.cmpi ne, %1, %c0_i32_0 : i32
    scf.if %2 {
      %cst_9 = arith.constant 0.000000e+00 : f32
      %11 = vector.broadcast %cst_9 : f32 to vector<2x32xf32>
      %c0_10 = arith.constant 0 : index
      %c0_11 = arith.constant 0 : index
      %12 = vector.load %arg6[%c0_10, %c0_11] : memref<2x32xf32, #tpu.memory_space<vmem>>, vector<2x32xf32>
      tpu.vector_store %arg6[%c0_10, %c0_11], %11 {strides = array<i32>} : memref<2x32xf32, #tpu.memory_space<vmem>>, vector<2x32xf32>,
    } else {
    }
    %c0 = arith.constant 0 : index
    %c0_1 = arith.constant 0 : index
    %3 = vector.load %arg6[%c0, %c0_1] : memref<2x32xf32, #tpu.memory_space<vmem>>, vector<2x32xf32>
    %c0_2 = arith.constant 0 : index
    %c0_3 = arith.constant 0 : index
    %c0_4 = arith.constant 0 : index
    %4 = vector.load %arg2[%c0_2, %c0_3, %c0_4] : memref<2x1024x32xf32, #tpu.memory_space<vmem>>, vector<2x1024x32xf32>
    %cst = arith.constant dense<0.000000e+00> : vector<2x32xf32>
    %5 = vector.multi_reduction <add>, %4, %cst [1] : vector<2x1024x32xf32> to vector<2x32xf32>
    %6 = arith.addf %3, %5 : vector<2x32xf32>
    %c0_5 = arith.constant 0 : index
    %c0_6 = arith.constant 0 : index
    %7 = vector.load %arg6[%c0_5, %c0_6] : memref<2x32xf32, #tpu.memory_space<vmem>>, vector<2x32xf32>
    tpu.vector_store %arg6[%c0_5, %c0_6], %6 {strides = array<i32>} : memref<2x32xf32, #tpu.memory_space<vmem>>, vector<2x32xf32>,
    %c0_i32_7 = arith.constant 0 : i32
    %8 = arith.cmpi eq, %arg1, %c0_i32_7 : i32
    %9 = arith.extui %8 : i1 to i32
    %c0_i32_8 = arith.constant 0 : i32
    %10 = arith.cmpi ne, %9, %c0_i32_8 : i32
    scf.if %10 {
      %c0_9 = arith.constant 0 : index
      %c0_10 = arith.constant 0 : index
      %11 = vector.load %arg6[%c0_9, %c0_10] : memref<2x32xf32, #tpu.memory_space<vmem>>, vector<2x32xf32>
      %c0_11 = arith.constant 0 : index
      %c0_12 = arith.constant 0 : index
      %12 = vector.load %arg3[%c0_11, %c0_12] : memref<32x8xf32, #tpu.memory_space<vmem>>, vector<32x8xf32>
      %cst_13 = arith.constant dense<0.000000e+00> : vector<2x8xf32>
      %13 = tpu.matmul %11, %12, %cst_13 {dimension_numbers = #tpu.dot_dimension_numbers<[1], [0], [0], [1], [0, 0, 1, 1], [], []>} : vector<2x32xf32>, vector<32x8xf32>, vector<2x8xf32> -> vector<2x8xf32>
      %c0_14 = arith.constant 0 : index
      %c0_15 = arith.constant 0 : index
      %14 = vector.load %arg4[%c0_14, %c0_15] : memref<1x8xf32, #tpu.memory_space<vmem>>, vector<1x8xf32>
      %15 = vector.broadcast %14 : vector<1x8xf32> to vector<2x8xf32>
      %16 = arith.addf %13, %15 : vector<2x8xf32>
      %c0_16 = arith.constant 0 : index
      %c0_17 = arith.constant 0 : index
      %17 = vector.load %arg5[%c0_16, %c0_17] : memref<2x8xf32, #tpu.memory_space<vmem>>, vector<2x8xf32>
      tpu.vector_store %arg5[%c0_16, %c0_17], %16 {strides = array<i32>} : memref<2x8xf32, #tpu.memory_space<vmem>>, vector<2x8xf32>,
    } else {
    }
    return
  }
  func.func @transform_0(%arg0: i32, %arg1: i32) -> (i32, i32, i32) {
    %c0_i32 = arith.constant 0 : i32
    %c0_i32_0 = arith.constant 0 : i32
    return %arg0, %arg1, %c0_i32 : i32, i32, i32
  }
  func.func @transform_1(%arg0: i32, %arg1: i32) -> (i32, i32) {
    %c0_i32 = arith.constant 0 : i32
    %c0_i32_0 = arith.constant 0 : i32
    %c0_i32_1 = arith.constant 0 : i32
    return %c0_i32, %c0_i32_0 : i32, i32
  }
  func.func @transform_2(%arg0: i32, %arg1: i32) -> (i32, i32) {
    %c0_i32 = arith.constant 0 : i32
    %c0_i32_0 = arith.constant 0 : i32
    %c0_i32_1 = arith.constant 0 : i32
    return %c0_i32, %c0_i32_0 : i32, i32
  }
  func.func @transform_3(%arg0: i32, %arg1: i32) -> (i32, i32) {
    %c0_i32 = arith.constant 0 : i32
    %c0_i32_0 = arith.constant 0 : i32
    return %arg0, %c0_i32 : i32, i32
  }
}

</mosaic_0001>

<bundles_post_ra>
// kernel: tpu_custom_call.1
= control target key start
LH: loop header
LB: loop body
LE: loop exit
PB: predicated region body
PF: predicated region fallthrough
CT: control target
= control target key end

     0   :  { %8 = vsyncpa [#allocation4], 0  ;;  %vm19_vm0 = vcmask 254976   ;;  %v892_v0 = vmov 0.0   ;;  %vm278_vm1 = vcmask 261120   ;;  %vm803_vm2 = vcmask 1041409   ;;  %s1959_s0 = inlined_call_operand.vmem [shape: f32[2,1024,32], index: 0, kind: input, shape index: {}]   ;;  %s1960_s1 = inlined_call_operand.vmem [shape: f32[32,8], index: 1, kind: input, shape index: {}]   ;;  %s1961_s2 = inlined_call_operand.vmem [shape: f32[1,8], index: 2, kind: input, shape index: {}]   ;;  %s1962_s3 = inlined_call_operand.hbm [shape: f32[2,8], index: 3, kind: output, shape index: {}]  }
   0x1   :  { %20 = vst.msk [vmem:[#allocation2] sm:$0x3] %vm19_vm0, %v892_v0  ;;  %v22_v1 = vld [vmem:[%s1959_s0] sm:$0xff]  ;;  %v23_v2 = vld [vmem:[%s1959_s0 + $0x8] sm:$0xff]  ;;  %v24_v3 = vld [vmem:[%s1959_s0 + $0x10] sm:$0xff]  ;;  %s893_s19 = smov [#allocation3]  }
   0x2   :  { %v279_v4 = vsel %vm278_vm1, %v22_v1, 0.0  ;;  %v280_v5 = vsel %vm278_vm1, %v23_v2, 0.0  ;;  %v25_v6 = vld [vmem:[%s1959_s0 + $0x18] sm:$0xff]  ;;  %v282_v8 = vsel %vm278_vm1, %v24_v3, 0.0  ;;  %v26_v9 = vld [vmem:[%s1959_s0 + $0x20] sm:$0xff]  ;;  %v27_v12 = vld [vmem:[%s1959_s0 + $0x28] sm:$0xff] }
   0x3   :  { %v281_v7 = vadd.f32 %v280_v5, %v279_v4  ;;  %v284_v11 = vsel %vm278_vm1, %v25_v6, 0.0  ;;  %v286_v14 = vsel %vm278_vm1, %v26_v9, 0.0  ;;  %v28_v15 = vld [vmem:[%s1959_s0 + $0x30] sm:$0xff]  ;;  %v288_v17 = vsel %vm278_vm1, %v27_v12, 0.0  ;;  %v29_v18 = vld [vmem:[%s1959_s0 + $0x38] sm:$0xff]  ;;  %v30_v21 = vld [vmem:[%s1959_s0 + $0x40] sm:$0xff] }
   0x4   :  { %v290_v20 = vsel %vm278_vm1, %v28_v15, 0.0  ;;  %v292_v23 = vsel %vm278_vm1, %v29_v18, 0.0  ;;  %v31_v24 = vld [vmem:[%s1959_s0 + $0x48] sm:$0xff]  ;;  %v294_v26 = vsel %vm278_vm1, %v30_v21, 0.0  ;;  %v32_v27 = vld [vmem:[%s1959_s0 + $0x50] sm:$0xff]  ;;  %v33_v30 = vld [vmem:[%s1959_s0 + $0x58] sm:$0xff] }
   0x5   :  { %v283_v10 = vadd.f32 %v282_v8, %v281_v7  ;;  %v296_v29 = vsel %vm278_vm1, %v31_v24, 0.0  ;;  %v298_v32 = vsel %vm278_vm1, %v32_v27, 0.0  ;;  %v34_v33 = vld [vmem:[%s1959_s0 + $0x60] sm:$0xff]  ;;  %v300_v35 = vsel %vm278_vm1, %v33_v30, 0.0  ;;  %v35_v36 = vld [vmem:[%s1959_s0 + $0x68] sm:$0xff]  ;;  %v36_v39 = vld [vmem:[%s1959_s0 + $0x70] sm:$0xff] }
   0x6   :  { %v302_v38 = vsel %vm278_vm1, %v34_v33, 0.0  ;;  %v304_v41 = vsel %vm278_vm1, %v35_v36, 0.0  ;;  %v37_v42 = vld [vmem:[%s1959_s0 + $0x78] sm:$0xff]  ;;  %v306_v44 = vsel %vm278_vm1, %v36_v39, 0.0  ;;  %v38_v45 = vld [vmem:[%s1959_s0 + $0x80] sm:$0xff]  ;;  %v39_v48 = vld [vmem:[%s1959_s0 + $0x88] sm:$0xff] }
   0x7   :  { %v285_v13 = vadd.f32 %v284_v11, %v283_v10  ;;  %v308_v47 = vsel %vm278_vm1, %v37_v42, 0.0  ;;  %v310_v50 = vsel %vm278_vm1, %v38_v45, 0.0  ;;  %v40_v51 = vld [vmem:[%s1959_s0 + $0x90] sm:$0xff]  ;;  %v150_v52 = vld [vmem:[%s1959_s0 + $0x400] sm:$0xff]  ;;  %v151_v53 = vld [vmem:[%s1959_s0 + $0x408] sm:$0xff]  ;;  %v312_v57 = vsel %vm278_vm1, %v39_v48, 0.0 }
   0x8   :  { %v152_v55 = vld [vmem:[%s1959_s0 + $0x410] sm:$0xff]  ;;  %v153_v56 = vld [vmem:[%s1959_s0 + $0x418] sm:$0xff]  ;;  %v540_v58 = vsel %vm278_vm1, %v150_v52, 0.0  ;;  %v541_v59 = vsel %vm278_vm1, %v151_v53, 0.0  ;;  %v154_v61 = vld [vmem:[%s1959_s0 + $0x420] sm:$0xff]  ;;  %v314_v1 = vsel %vm278_vm1, %v40_v51, 0.0 }
   0x9   :  { %v287_v16 = vadd.f32 %v286_v14, %v285_v13  ;;  %v41_v60 = vld [vmem:[%s1959_s0 + $0x98] sm:$0xff]  ;;  %v542_v63 = vadd.f32 %v541_v59, %v540_v58  ;;  %v543_v0 = vsel %vm278_vm1, %v152_v55, 0.0  ;;  %v545_v2 = vsel %vm278_vm1, %v153_v56, 0.0  ;;  %v42_v3 = vld [vmem:[%s1959_s0 + $0xa0] sm:$0xff]  ;;  %v155_v6 = vld [vmem:[%s1959_s0 + $0x428] sm:$0xff]  ;;  %s851_s20 = sshll.u32 %s893_s19, 4  ;;  %s852_s20 = int_to_ptr.vmem [resolvable:$true] %s851_s20 }
   0xa   :  { %v316_v7 = vsel %vm278_vm1, %v41_v60, 0.0  ;;  %v547_v8 = vsel %vm278_vm1, %v154_v61, 0.0  ;;  %v43_v9 = vld [vmem:[%s1959_s0 + $0xa8] sm:$0xff]  ;;  %v44_v12 = vld [vmem:[%s1959_s0 + $0xb0] sm:$0xff]  ;;  %v318_v14 = vsel %vm278_vm1, %v42_v3, 0.0  ;;  %v45_v15 = vld [vmem:[%s1959_s0 + $0xb8] sm:$0xff] }
   0xb   :  { %v289_v19 = vadd.f32 %v288_v17, %v287_v16  ;;  %v544_v5 = vadd.f32 %v543_v0, %v542_v63  ;;  %v156_v13 = vld [vmem:[%s1959_s0 + $0x430] sm:$0xff]  ;;  %v549_v18 = vsel %vm278_vm1, %v155_v6, 0.0  ;;  %v46_v21 = vld [vmem:[%s1959_s0 + $0xc0] sm:$0xff]  ;;  %v51_v52 = vld [vmem:[%s1959_s0 + $0xe8] sm:$0xff]  ;;  %s853_s23 = sshll.u32 %s1962_s3, 4  ;;  %vm844_vm3 = vcmask 58368   ;;  %s854_s23 = int_to_ptr.hbm [resolvable:$true] %s853_s23 }
   0xc   :  { %v551_v24 = vsel %vm278_vm1, %v156_v13, 0.0  ;;  %v163_v55 = vld [vmem:[%s1959_s0 + $0x468] sm:$0xff]  ;;  %v52_v58 = vld [vmem:[%s1959_s0 + $0xf0] sm:$0xff]  ;;  %v53_v0 = vld [vmem:[%s1959_s0 + $0xf8] sm:$0xff] }
   0xd   :  { %v291_v22 = vadd.f32 %v290_v20, %v289_v19  ;;  %v546_v11 = vadd.f32 %v545_v2, %v544_v5  ;;  %v157_v19 = vld [vmem:[%s1959_s0 + $0x438] sm:$0xff]  ;;  %v320_v20 = vsel %vm278_vm1, %v43_v9, 0.0  ;;  %v164_v61 = vld [vmem:[%s1959_s0 + $0x470] sm:$0xff]  ;;  %v565_v2 = vsel %vm278_vm1, %v163_v55, 0.0  ;;  %v54_v6 = vld [vmem:[%s1959_s0 + $0x100] sm:$0xff] }
   0xe   :  { %v553_v30 = vsel %vm278_vm1, %v157_v19, 0.0  ;;  %v165_v3 = vld [vmem:[%s1959_s0 + $0x478] sm:$0xff]  ;;  %v166_v9 = vld [vmem:[%s1959_s0 + $0x480] sm:$0xff] }
   0xf   :  { %v293_v25 = vadd.f32 %v292_v23, %v291_v22  ;;  %v548_v17 = vadd.f32 %v547_v8, %v546_v11  ;;  %v322_v23 = vsel %vm278_vm1, %v44_v12, 0.0  ;;  %v567_v8 = vsel %vm278_vm1, %v164_v61, 0.0  ;;  %v55_v12 = vld [vmem:[%s1959_s0 + $0x108] sm:$0xff] }
  0x11   :  { %v295_v28 = vadd.f32 %v294_v26, %v293_v25  ;;  %v158_v25 = vld [vmem:[%s1959_s0 + $0x440] sm:$0xff]  ;;  %v324_v26 = vsel %vm278_vm1, %v45_v15, 0.0  ;;  %v550_v27 = vadd.f32 %v549_v18, %v548_v17  ;;  %v167_v15 = vld [vmem:[%s1959_s0 + $0x488] sm:$0xff]  ;;  %v56_v18 = vld [vmem:[%s1959_s0 + $0x110] sm:$0xff] }
  0x12   :  { %v555_v36 = vsel %vm278_vm1, %v158_v25, 0.0 }
  0x13   :  { %v297_v31 = vadd.f32 %v296_v29, %v295_v28  ;;  %v47_v28 = vld [vmem:[%s1959_s0 + $0xc8] sm:$0xff]  ;;  %v552_v33 = vadd.f32 %v551_v24, %v550_v27  ;;  %v57_v24 = vld [vmem:[%s1959_s0 + $0x118] sm:$0xff] }
  0x14   :  { %v169_v27 = vld [vmem:[%s1959_s0 + $0x498] sm:$0xff] }
  0x15   :  { %v299_v34 = vadd.f32 %v298_v32, %v297_v31  ;;  %v159_v31 = vld [vmem:[%s1959_s0 + $0x448] sm:$0xff]  ;;  %v326_v32 = vsel %vm278_vm1, %v46_v21, 0.0  ;;  %v554_v39 = vadd.f32 %v553_v30, %v552_v33  ;;  %v168_v21 = vld [vmem:[%s1959_s0 + $0x490] sm:$0xff]  ;;  %v58_v30 = vld [vmem:[%s1959_s0 + $0x120] sm:$0xff] }
  0x16   :  { %v557_v42 = vsel %vm278_vm1, %v159_v31, 0.0  ;;  %v170_v33 = vld [vmem:[%s1959_s0 + $0x4a0] sm:$0xff] }
  0x17   :  { %v301_v37 = vadd.f32 %v300_v35, %v299_v34  ;;  %v48_v34 = vld [vmem:[%s1959_s0 + $0xd0] sm:$0xff]  ;;  %v556_v45 = vadd.f32 %v555_v36, %v554_v39  ;;  %v59_v36 = vld [vmem:[%s1959_s0 + $0x128] sm:$0xff] }
  0x18   :  { %v171_v39 = vld [vmem:[%s1959_s0 + $0x4a8] sm:$0xff] }
  0x19   :  { %v303_v40 = vadd.f32 %v302_v38, %v301_v37  ;;  %v160_v37 = vld [vmem:[%s1959_s0 + $0x450] sm:$0xff]  ;;  %v328_v38 = vsel %vm278_vm1, %v47_v28, 0.0  ;;  %v558_v51 = vadd.f32 %v557_v42, %v556_v45  ;;  %v346_v28 = vsel %vm278_vm1, %v56_v18, 0.0 }
  0x1a   :  { %v559_v48 = vsel %vm278_vm1, %v160_v37, 0.0  ;;  %v60_v42 = vld [vmem:[%s1959_s0 + $0x130] sm:$0xff] }
  0x1b   :  { %v305_v43 = vadd.f32 %v304_v41, %v303_v40  ;;  %v49_v40 = vld [vmem:[%s1959_s0 + $0xd8] sm:$0xff]  ;;  %v172_v45 = vld [vmem:[%s1959_s0 + $0x4b0] sm:$0xff] }
  0x1d   :  { %v307_v46 = vadd.f32 %v306_v44, %v305_v43  ;;  %v161_v43 = vld [vmem:[%s1959_s0 + $0x458] sm:$0xff]  ;;  %v330_v44 = vsel %vm278_vm1, %v48_v34, 0.0  ;;  %v348_v34 = vsel %vm278_vm1, %v57_v24, 0.0 }
  0x1f   :  { %v309_v49 = vadd.f32 %v308_v47, %v307_v46  ;;  %v50_v46 = vld [vmem:[%s1959_s0 + $0xe0] sm:$0xff] }
  0x20   :  { %v334_v56 = vsel %vm278_vm1, %v50_v46, 0.0  ;;  %v352_v46 = vsel %vm278_vm1, %v59_v36, 0.0 }
  0x21   :  { %v311_v54 = vadd.f32 %v310_v50, %v309_v49  ;;  %v162_v49 = vld [vmem:[%s1959_s0 + $0x460] sm:$0xff]  ;;  %v332_v50 = vsel %vm278_vm1, %v49_v40, 0.0  ;;  %v350_v40 = vsel %vm278_vm1, %v58_v30, 0.0 }
  0x22   :  { %v563_v60 = vsel %vm278_vm1, %v162_v49, 0.0 }
  0x23   :  { %v313_v62 = vadd.f32 %v312_v57, %v311_v54  ;;  %v561_v54 = vsel %vm278_vm1, %v161_v43, 0.0  ;;  %v560_v57 = vadd.f32 %v559_v48, %v558_v51  ;;  %v61_v48 = vld [vmem:[%s1959_s0 + $0x138] sm:$0xff] }
  0x24   :  { %v173_v51 = vld [vmem:[%s1959_s0 + $0x4b8] sm:$0xff] }
  0x25   :  { %v315_v4 = vadd.f32 %v314_v1, %v313_v62  ;;  %v336_v62 = vsel %vm278_vm1, %v51_v52, 0.0  ;;  %v562_v63 = vadd.f32 %v561_v54, %v560_v57  ;;  %v354_v52 = vsel %vm278_vm1, %v60_v42, 0.0  ;;  %v62_v54 = vld [vmem:[%s1959_s0 + $0x140] sm:$0xff] }
  0x26   :  { %v174_v57 = vld [vmem:[%s1959_s0 + $0x4c0] sm:$0xff] }
  0x27   :  { %v317_v10 = vadd.f32 %v316_v7, %v315_v4  ;;  %v338_v4 = vsel %vm278_vm1, %v52_v58, 0.0  ;;  %v564_v5 = vadd.f32 %v563_v60, %v562_v63  ;;  %v356_v58 = vsel %vm278_vm1, %v61_v48, 0.0  ;;  %v63_v60 = vld [vmem:[%s1959_s0 + $0x148] sm:$0xff] }
  0x28   :  { %v175_v63 = vld [vmem:[%s1959_s0 + $0x4c8] sm:$0xff] }
  0x29   :  { %v319_v16 = vadd.f32 %v318_v14, %v317_v10  ;;  %v340_v10 = vsel %vm278_vm1, %v53_v0, 0.0  ;;  %v566_v11 = vadd.f32 %v565_v2, %v564_v5  ;;  %v569_v14 = vsel %vm278_vm1, %v165_v3, 0.0  ;;  %v64_v2 = vld [vmem:[%s1959_s0 + $0x150] sm:$0xff] }
  0x2a   :  { %v358_v0 = vsel %vm278_vm1, %v62_v54, 0.0  ;;  %v176_v5 = vld [vmem:[%s1959_s0 + $0x4d0] sm:$0xff] }
  0x2b   :  { %v321_v22 = vadd.f32 %v320_v20, %v319_v16  ;;  %v342_v16 = vsel %vm278_vm1, %v54_v6, 0.0  ;;  %v568_v17 = vadd.f32 %v567_v8, %v566_v11  ;;  %v571_v20 = vsel %vm278_vm1, %v166_v9, 0.0  ;;  %v65_v8 = vld [vmem:[%s1959_s0 + $0x158] sm:$0xff] }
  0x2c   :  { %v360_v6 = vsel %vm278_vm1, %v63_v60, 0.0  ;;  %v177_v11 = vld [vmem:[%s1959_s0 + $0x4d8] sm:$0xff]  ;;  %v364_v18 = vsel %vm278_vm1, %v65_v8, 0.0 }
  0x2d   :  { %v323_v29 = vadd.f32 %v322_v23, %v321_v22  ;;  %v344_v22 = vsel %vm278_vm1, %v55_v12, 0.0  ;;  %v570_v23 = vadd.f32 %v569_v14, %v568_v17  ;;  %v362_v12 = vsel %vm278_vm1, %v64_v2, 0.0  ;;  %v66_v14 = vld [vmem:[%s1959_s0 + $0x160] sm:$0xff] }
  0x2e   :  { %v178_v17 = vld [vmem:[%s1959_s0 + $0x4e0] sm:$0xff]  ;;  %v366_v24 = vsel %vm278_vm1, %v66_v14, 0.0 }
  0x2f   :  { %v325_v35 = vadd.f32 %v324_v26, %v323_v29  ;;  %v573_v26 = vsel %vm278_vm1, %v167_v15, 0.0  ;;  %v572_v29 = vadd.f32 %v571_v20, %v570_v23  ;;  %v67_v20 = vld [vmem:[%s1959_s0 + $0x168] sm:$0xff] }
  0x30   :  { %v179_v23 = vld [vmem:[%s1959_s0 + $0x4e8] sm:$0xff]  ;;  %v368_v30 = vsel %vm278_vm1, %v67_v20, 0.0 }
  0x31   :  { %v327_v41 = vadd.f32 %v326_v32, %v325_v35  ;;  %v575_v32 = vsel %vm278_vm1, %v168_v21, 0.0  ;;  %v574_v35 = vadd.f32 %v573_v26, %v572_v29  ;;  %v68_v26 = vld [vmem:[%s1959_s0 + $0x170] sm:$0xff] }
  0x32   :  { %v180_v29 = vld [vmem:[%s1959_s0 + $0x4f0] sm:$0xff]  ;;  %v370_v36 = vsel %vm278_vm1, %v68_v26, 0.0 }
  0x33   :  { %v329_v47 = vadd.f32 %v328_v38, %v327_v41  ;;  %v577_v38 = vsel %vm278_vm1, %v169_v27, 0.0  ;;  %v576_v41 = vadd.f32 %v575_v32, %v574_v35  ;;  %v69_v32 = vld [vmem:[%s1959_s0 + $0x178] sm:$0xff] }
  0x34   :  { %v181_v35 = vld [vmem:[%s1959_s0 + $0x4f8] sm:$0xff]  ;;  %v372_v42 = vsel %vm278_vm1, %v69_v32, 0.0 }
  0x35   :  { %v331_v53 = vadd.f32 %v330_v44, %v329_v47  ;;  %v579_v44 = vsel %vm278_vm1, %v170_v33, 0.0  ;;  %v578_v47 = vadd.f32 %v577_v38, %v576_v41  ;;  %v70_v38 = vld [vmem:[%s1959_s0 + $0x180] sm:$0xff] }
  0x36   :  { %v182_v41 = vld [vmem:[%s1959_s0 + $0x500] sm:$0xff]  ;;  %v374_v48 = vsel %vm278_vm1, %v70_v38, 0.0 }
  0x37   :  { %v333_v59 = vadd.f32 %v332_v50, %v331_v53  ;;  %v581_v50 = vsel %vm278_vm1, %v171_v39, 0.0  ;;  %v580_v53 = vadd.f32 %v579_v44, %v578_v47  ;;  %v71_v44 = vld [vmem:[%s1959_s0 + $0x188] sm:$0xff] }
  0x38   :  { %v183_v47 = vld [vmem:[%s1959_s0 + $0x508] sm:$0xff]  ;;  %v376_v54 = vsel %vm278_vm1, %v71_v44, 0.0 }
  0x39   :  { %v335_v1 = vadd.f32 %v334_v56, %v333_v59  ;;  %v583_v56 = vsel %vm278_vm1, %v172_v45, 0.0  ;;  %v582_v59 = vadd.f32 %v581_v50, %v580_v53  ;;  %v72_v50 = vld [vmem:[%s1959_s0 + $0x190] sm:$0xff] }
  0x3a   :  { %v184_v53 = vld [vmem:[%s1959_s0 + $0x510] sm:$0xff]  ;;  %v378_v60 = vsel %vm278_vm1, %v72_v50, 0.0 }
  0x3b   :  { %v337_v7 = vadd.f32 %v336_v62, %v335_v1  ;;  %v585_v62 = vsel %vm278_vm1, %v173_v51, 0.0  ;;  %v584_v1 = vadd.f32 %v583_v56, %v582_v59  ;;  %v73_v56 = vld [vmem:[%s1959_s0 + $0x198] sm:$0xff] }
  0x3c   :  { %v185_v59 = vld [vmem:[%s1959_s0 + $0x518] sm:$0xff]  ;;  %v380_v2 = vsel %vm278_vm1, %v73_v56, 0.0 }
  0x3d   :  { %v339_v13 = vadd.f32 %v338_v4, %v337_v7  ;;  %v587_v4 = vsel %vm278_vm1, %v174_v57, 0.0  ;;  %v586_v7 = vadd.f32 %v585_v62, %v584_v1  ;;  %v74_v62 = vld [vmem:[%s1959_s0 + $0x1a0] sm:$0xff] }
  0x3e   :  { %v186_v1 = vld [vmem:[%s1959_s0 + $0x520] sm:$0xff]  ;;  %v382_v8 = vsel %vm278_vm1, %v74_v62, 0.0 }
  0x3f   :  { %v341_v19 = vadd.f32 %v340_v10, %v339_v13  ;;  %v589_v10 = vsel %vm278_vm1, %v175_v63, 0.0  ;;  %v588_v13 = vadd.f32 %v587_v4, %v586_v7  ;;  %v75_v4 = vld [vmem:[%s1959_s0 + $0x1a8] sm:$0xff] }
  0x40   :  { %v187_v7 = vld [vmem:[%s1959_s0 + $0x528] sm:$0xff]  ;;  %v384_v14 = vsel %vm278_vm1, %v75_v4, 0.0 }
  0x41   :  { %v343_v25 = vadd.f32 %v342_v16, %v341_v19  ;;  %v591_v16 = vsel %vm278_vm1, %v176_v5, 0.0  ;;  %v590_v19 = vadd.f32 %v589_v10, %v588_v13  ;;  %v76_v10 = vld [vmem:[%s1959_s0 + $0x1b0] sm:$0xff] }
  0x42   :  { %v188_v13 = vld [vmem:[%s1959_s0 + $0x530] sm:$0xff]  ;;  %v386_v20 = vsel %vm278_vm1, %v76_v10, 0.0 }
  0x43   :  { %v345_v31 = vadd.f32 %v344_v22, %v343_v25  ;;  %v593_v22 = vsel %vm278_vm1, %v177_v11, 0.0  ;;  %v592_v25 = vadd.f32 %v591_v16, %v590_v19  ;;  %v77_v16 = vld [vmem:[%s1959_s0 + $0x1b8] sm:$0xff] }
  0x44   :  { %v189_v19 = vld [vmem:[%s1959_s0 + $0x538] sm:$0xff]  ;;  %v388_v26 = vsel %vm278_vm1, %v77_v16, 0.0 }
  0x45   :  { %v347_v37 = vadd.f32 %v346_v28, %v345_v31  ;;  %v595_v28 = vsel %vm278_vm1, %v178_v17, 0.0  ;;  %v594_v31 = vadd.f32 %v593_v22, %v592_v25  ;;  %v78_v22 = vld [vmem:[%s1959_s0 + $0x1c0] sm:$0xff] }
  0x46   :  { %v190_v25 = vld [vmem:[%s1959_s0 + $0x540] sm:$0xff]  ;;  %v390_v32 = vsel %vm278_vm1, %v78_v22, 0.0 }
  0x47   :  { %v349_v43 = vadd.f32 %v348_v34, %v347_v37  ;;  %v597_v34 = vsel %vm278_vm1, %v179_v23, 0.0  ;;  %v596_v37 = vadd.f32 %v595_v28, %v594_v31  ;;  %v79_v28 = vld [vmem:[%s1959_s0 + $0x1c8] sm:$0xff] }
  0x48   :  { %v191_v31 = vld [vmem:[%s1959_s0 + $0x548] sm:$0xff]  ;;  %v392_v38 = vsel %vm278_vm1, %v79_v28, 0.0 }
  0x49   :  { %v351_v49 = vadd.f32 %v350_v40, %v349_v43  ;;  %v599_v40 = vsel %vm278_vm1, %v180_v29, 0.0  ;;  %v598_v43 = vadd.f32 %v597_v34, %v596_v37  ;;  %v80_v34 = vld [vmem:[%s1959_s0 + $0x1d0] sm:$0xff] }
  0x4a   :  { %v192_v37 = vld [vmem:[%s1959_s0 + $0x550] sm:$0xff]  ;;  %v394_v44 = vsel %vm278_vm1, %v80_v34, 0.0 }
  0x4b   :  { %v353_v55 = vadd.f32 %v352_v46, %v351_v49  ;;  %v601_v46 = vsel %vm278_vm1, %v181_v35, 0.0  ;;  %v600_v49 = vadd.f32 %v599_v40, %v598_v43  ;;  %v81_v40 = vld [vmem:[%s1959_s0 + $0x1d8] sm:$0xff] }
  0x4c   :  { %v193_v43 = vld [vmem:[%s1959_s0 + $0x558] sm:$0xff]  ;;  %v396_v50 = vsel %vm278_vm1, %v81_v40, 0.0 }
  0x4d   :  { %v355_v61 = vadd.f32 %v354_v52, %v353_v55  ;;  %v603_v52 = vsel %vm278_vm1, %v182_v41, 0.0  ;;  %v602_v55 = vadd.f32 %v601_v46, %v600_v49  ;;  %v82_v46 = vld [vmem:[%s1959_s0 + $0x1e0] sm:$0xff] }
  0x4e   :  { %v194_v49 = vld [vmem:[%s1959_s0 + $0x560] sm:$0xff]  ;;  %v398_v56 = vsel %vm278_vm1, %v82_v46, 0.0 }
  0x4f   :  { %v357_v3 = vadd.f32 %v356_v58, %v355_v61  ;;  %v605_v58 = vsel %vm278_vm1, %v183_v47, 0.0  ;;  %v604_v61 = vadd.f32 %v603_v52, %v602_v55  ;;  %v83_v52 = vld [vmem:[%s1959_s0 + $0x1e8] sm:$0xff] }
  0x50   :  { %v195_v55 = vld [vmem:[%s1959_s0 + $0x568] sm:$0xff]  ;;  %v400_v62 = vsel %vm278_vm1, %v83_v52, 0.0 }
  0x51   :  { %v359_v9 = vadd.f32 %v358_v0, %v357_v3  ;;  %v607_v0 = vsel %vm278_vm1, %v184_v53, 0.0  ;;  %v606_v3 = vadd.f32 %v605_v58, %v604_v61  ;;  %v84_v58 = vld [vmem:[%s1959_s0 + $0x1f0] sm:$0xff] }
  0x52   :  { %v196_v61 = vld [vmem:[%s1959_s0 + $0x570] sm:$0xff]  ;;  %v402_v4 = vsel %vm278_vm1, %v84_v58, 0.0 }
  0x53   :  { %v361_v15 = vadd.f32 %v360_v6, %v359_v9  ;;  %v609_v6 = vsel %vm278_vm1, %v185_v59, 0.0  ;;  %v608_v9 = vadd.f32 %v607_v0, %v606_v3  ;;  %v85_v0 = vld [vmem:[%s1959_s0 + $0x1f8] sm:$0xff] }
  0x54   :  { %v197_v3 = vld [vmem:[%s1959_s0 + $0x578] sm:$0xff]  ;;  %v404_v10 = vsel %vm278_vm1, %v85_v0, 0.0 }
  0x55   :  { %v363_v21 = vadd.f32 %v362_v12, %v361_v15  ;;  %v611_v12 = vsel %vm278_vm1, %v186_v1, 0.0  ;;  %v610_v15 = vadd.f32 %v609_v6, %v608_v9  ;;  %v86_v6 = vld [vmem:[%s1959_s0 + $0x200] sm:$0xff] }
  0x56   :  { %v198_v9 = vld [vmem:[%s1959_s0 + $0x580] sm:$0xff]  ;;  %v406_v16 = vsel %vm278_vm1, %v86_v6, 0.0 }
  0x57   :  { %v365_v27 = vadd.f32 %v364_v18, %v363_v21  ;;  %v613_v18 = vsel %vm278_vm1, %v187_v7, 0.0  ;;  %v612_v21 = vadd.f32 %v611_v12, %v610_v15  ;;  %v87_v12 = vld [vmem:[%s1959_s0 + $0x208] sm:$0xff] }
  0x58   :  { %v199_v15 = vld [vmem:[%s1959_s0 + $0x588] sm:$0xff]  ;;  %v408_v22 = vsel %vm278_vm1, %v87_v12, 0.0 }
  0x59   :  { %v367_v33 = vadd.f32 %v366_v24, %v365_v27  ;;  %v615_v24 = vsel %vm278_vm1, %v188_v13, 0.0  ;;  %v614_v27 = vadd.f32 %v613_v18, %v612_v21  ;;  %v88_v18 = vld [vmem:[%s1959_s0 + $0x210] sm:$0xff] }
  0x5a   :  { %v200_v21 = vld [vmem:[%s1959_s0 + $0x590] sm:$0xff]  ;;  %v410_v28 = vsel %vm278_vm1, %v88_v18, 0.0 }
  0x5b   :  { %v369_v39 = vadd.f32 %v368_v30, %v367_v33  ;;  %v617_v30 = vsel %vm278_vm1, %v189_v19, 0.0  ;;  %v616_v33 = vadd.f32 %v615_v24, %v614_v27  ;;  %v89_v24 = vld [vmem:[%s1959_s0 + $0x218] sm:$0xff] }
  0x5c   :  { %v201_v27 = vld [vmem:[%s1959_s0 + $0x598] sm:$0xff]  ;;  %v412_v34 = vsel %vm278_vm1, %v89_v24, 0.0 }
  0x5d   :  { %v371_v45 = vadd.f32 %v370_v36, %v369_v39  ;;  %v619_v36 = vsel %vm278_vm1, %v190_v25, 0.0  ;;  %v618_v39 = vadd.f32 %v617_v30, %v616_v33  ;;  %v90_v30 = vld [vmem:[%s1959_s0 + $0x220] sm:$0xff] }
  0x5e   :  { %v202_v33 = vld [vmem:[%s1959_s0 + $0x5a0] sm:$0xff]  ;;  %v414_v40 = vsel %vm278_vm1, %v90_v30, 0.0 }
  0x5f   :  { %v373_v51 = vadd.f32 %v372_v42, %v371_v45  ;;  %v621_v42 = vsel %vm278_vm1, %v191_v31, 0.0  ;;  %v620_v45 = vadd.f32 %v619_v36, %v618_v39  ;;  %v91_v36 = vld [vmem:[%s1959_s0 + $0x228] sm:$0xff] }
  0x60   :  { %v203_v39 = vld [vmem:[%s1959_s0 + $0x5a8] sm:$0xff]  ;;  %v416_v46 = vsel %vm278_vm1, %v91_v36, 0.0 }
  0x61   :  { %v375_v57 = vadd.f32 %v374_v48, %v373_v51  ;;  %v623_v48 = vsel %vm278_vm1, %v192_v37, 0.0  ;;  %v622_v51 = vadd.f32 %v621_v42, %v620_v45  ;;  %v92_v42 = vld [vmem:[%s1959_s0 + $0x230] sm:$0xff] }
  0x62   :  { %v204_v45 = vld [vmem:[%s1959_s0 + $0x5b0] sm:$0xff]  ;;  %v418_v52 = vsel %vm278_vm1, %v92_v42, 0.0 }
  0x63   :  { %v377_v63 = vadd.f32 %v376_v54, %v375_v57  ;;  %v625_v54 = vsel %vm278_vm1, %v193_v43, 0.0  ;;  %v624_v57 = vadd.f32 %v623_v48, %v622_v51  ;;  %v93_v48 = vld [vmem:[%s1959_s0 + $0x238] sm:$0xff] }
  0x64   :  { %v205_v51 = vld [vmem:[%s1959_s0 + $0x5b8] sm:$0xff]  ;;  %v420_v58 = vsel %vm278_vm1, %v93_v48, 0.0 }
  0x65   :  { %v379_v5 = vadd.f32 %v378_v60, %v377_v63  ;;  %v627_v60 = vsel %vm278_vm1, %v194_v49, 0.0  ;;  %v626_v63 = vadd.f32 %v625_v54, %v624_v57  ;;  %v94_v54 = vld [vmem:[%s1959_s0 + $0x240] sm:$0xff] }
  0x66   :  { %v206_v57 = vld [vmem:[%s1959_s0 + $0x5c0] sm:$0xff]  ;;  %v422_v0 = vsel %vm278_vm1, %v94_v54, 0.0 }
  0x67   :  { %v381_v11 = vadd.f32 %v380_v2, %v379_v5  ;;  %v629_v2 = vsel %vm278_vm1, %v195_v55, 0.0  ;;  %v628_v5 = vadd.f32 %v627_v60, %v626_v63  ;;  %v95_v60 = vld [vmem:[%s1959_s0 + $0x248] sm:$0xff] }
  0x68   :  { %v207_v63 = vld [vmem:[%s1959_s0 + $0x5c8] sm:$0xff]  ;;  %v424_v6 = vsel %vm278_vm1, %v95_v60, 0.0 }
  0x69   :  { %v383_v17 = vadd.f32 %v382_v8, %v381_v11  ;;  %v631_v8 = vsel %vm278_vm1, %v196_v61, 0.0  ;;  %v630_v11 = vadd.f32 %v629_v2, %v628_v5  ;;  %v96_v2 = vld [vmem:[%s1959_s0 + $0x250] sm:$0xff] }
  0x6a   :  { %v208_v5 = vld [vmem:[%s1959_s0 + $0x5d0] sm:$0xff]  ;;  %v426_v12 = vsel %vm278_vm1, %v96_v2, 0.0 }
  0x6b   :  { %v385_v23 = vadd.f32 %v384_v14, %v383_v17  ;;  %v633_v14 = vsel %vm278_vm1, %v197_v3, 0.0  ;;  %v632_v17 = vadd.f32 %v631_v8, %v630_v11  ;;  %v97_v8 = vld [vmem:[%s1959_s0 + $0x258] sm:$0xff] }
  0x6c   :  { %v209_v11 = vld [vmem:[%s1959_s0 + $0x5d8] sm:$0xff]  ;;  %v428_v18 = vsel %vm278_vm1, %v97_v8, 0.0 }
  0x6d   :  { %v387_v29 = vadd.f32 %v386_v20, %v385_v23  ;;  %v635_v20 = vsel %vm278_vm1, %v198_v9, 0.0  ;;  %v634_v23 = vadd.f32 %v633_v14, %v632_v17  ;;  %v98_v14 = vld [vmem:[%s1959_s0 + $0x260] sm:$0xff] }
  0x6e   :  { %v210_v17 = vld [vmem:[%s1959_s0 + $0x5e0] sm:$0xff]  ;;  %v430_v24 = vsel %vm278_vm1, %v98_v14, 0.0 }
  0x6f   :  { %v389_v35 = vadd.f32 %v388_v26, %v387_v29  ;;  %v637_v26 = vsel %vm278_vm1, %v199_v15, 0.0  ;;  %v636_v29 = vadd.f32 %v635_v20, %v634_v23  ;;  %v99_v20 = vld [vmem:[%s1959_s0 + $0x268] sm:$0xff] }
  0x70   :  { %v211_v23 = vld [vmem:[%s1959_s0 + $0x5e8] sm:$0xff]  ;;  %v432_v30 = vsel %vm278_vm1, %v99_v20, 0.0 }
  0x71   :  { %v391_v41 = vadd.f32 %v390_v32, %v389_v35  ;;  %v639_v32 = vsel %vm278_vm1, %v200_v21, 0.0  ;;  %v638_v35 = vadd.f32 %v637_v26, %v636_v29  ;;  %v100_v26 = vld [vmem:[%s1959_s0 + $0x270] sm:$0xff] }
  0x72   :  { %v212_v29 = vld [vmem:[%s1959_s0 + $0x5f0] sm:$0xff]  ;;  %v434_v36 = vsel %vm278_vm1, %v100_v26, 0.0 }
  0x73   :  { %v393_v47 = vadd.f32 %v392_v38, %v391_v41  ;;  %v641_v38 = vsel %vm278_vm1, %v201_v27, 0.0  ;;  %v640_v41 = vadd.f32 %v639_v32, %v638_v35  ;;  %v101_v32 = vld [vmem:[%s1959_s0 + $0x278] sm:$0xff] }
  0x74   :  { %v213_v35 = vld [vmem:[%s1959_s0 + $0x5f8] sm:$0xff]  ;;  %v436_v42 = vsel %vm278_vm1, %v101_v32, 0.0 }
  0x75   :  { %v395_v53 = vadd.f32 %v394_v44, %v393_v47  ;;  %v643_v44 = vsel %vm278_vm1, %v202_v33, 0.0  ;;  %v642_v47 = vadd.f32 %v641_v38, %v640_v41  ;;  %v102_v38 = vld [vmem:[%s1959_s0 + $0x280] sm:$0xff] }
  0x76   :  { %v214_v41 = vld [vmem:[%s1959_s0 + $0x600] sm:$0xff]  ;;  %v438_v48 = vsel %vm278_vm1, %v102_v38, 0.0 }
  0x77   :  { %v397_v59 = vadd.f32 %v396_v50, %v395_v53  ;;  %v645_v50 = vsel %vm278_vm1, %v203_v39, 0.0  ;;  %v644_v53 = vadd.f32 %v643_v44, %v642_v47  ;;  %v103_v44 = vld [vmem:[%s1959_s0 + $0x288] sm:$0xff] }
  0x78   :  { %v215_v47 = vld [vmem:[%s1959_s0 + $0x608] sm:$0xff]  ;;  %v440_v54 = vsel %vm278_vm1, %v103_v44, 0.0 }
  0x79   :  { %v399_v1 = vadd.f32 %v398_v56, %v397_v59  ;;  %v647_v56 = vsel %vm278_vm1, %v204_v45, 0.0  ;;  %v646_v59 = vadd.f32 %v645_v50, %v644_v53  ;;  %v104_v50 = vld [vmem:[%s1959_s0 + $0x290] sm:$0xff] }
  0x7a   :  { %v216_v53 = vld [vmem:[%s1959_s0 + $0x610] sm:$0xff]  ;;  %v442_v60 = vsel %vm278_vm1, %v104_v50, 0.0 }
  0x7b   :  { %v401_v7 = vadd.f32 %v400_v62, %v399_v1  ;;  %v649_v62 = vsel %vm278_vm1, %v205_v51, 0.0  ;;  %v648_v1 = vadd.f32 %v647_v56, %v646_v59  ;;  %v105_v56 = vld [vmem:[%s1959_s0 + $0x298] sm:$0xff] }
  0x7c   :  { %v217_v59 = vld [vmem:[%s1959_s0 + $0x618] sm:$0xff]  ;;  %v444_v2 = vsel %vm278_vm1, %v105_v56, 0.0 }
  0x7d   :  { %v403_v13 = vadd.f32 %v402_v4, %v401_v7  ;;  %v651_v4 = vsel %vm278_vm1, %v206_v57, 0.0  ;;  %v650_v7 = vadd.f32 %v649_v62, %v648_v1  ;;  %v106_v62 = vld [vmem:[%s1959_s0 + $0x2a0] sm:$0xff] }
  0x7e   :  { %v218_v1 = vld [vmem:[%s1959_s0 + $0x620] sm:$0xff]  ;;  %v446_v8 = vsel %vm278_vm1, %v106_v62, 0.0 }
  0x7f   :  { %v405_v19 = vadd.f32 %v404_v10, %v403_v13  ;;  %v653_v10 = vsel %vm278_vm1, %v207_v63, 0.0  ;;  %v652_v13 = vadd.f32 %v651_v4, %v650_v7  ;;  %v107_v4 = vld [vmem:[%s1959_s0 + $0x2a8] sm:$0xff] }
  0x80   :  { %v219_v7 = vld [vmem:[%s1959_s0 + $0x628] sm:$0xff]  ;;  %v448_v14 = vsel %vm278_vm1, %v107_v4, 0.0 }
  0x81   :  { %v407_v25 = vadd.f32 %v406_v16, %v405_v19  ;;  %v655_v16 = vsel %vm278_vm1, %v208_v5, 0.0  ;;  %v654_v19 = vadd.f32 %v653_v10, %v652_v13  ;;  %v108_v10 = vld [vmem:[%s1959_s0 + $0x2b0] sm:$0xff] }
  0x82   :  { %v220_v13 = vld [vmem:[%s1959_s0 + $0x630] sm:$0xff]  ;;  %v450_v20 = vsel %vm278_vm1, %v108_v10, 0.0 }
  0x83   :  { %v409_v31 = vadd.f32 %v408_v22, %v407_v25  ;;  %v657_v22 = vsel %vm278_vm1, %v209_v11, 0.0  ;;  %v656_v25 = vadd.f32 %v655_v16, %v654_v19  ;;  %v109_v16 = vld [vmem:[%s1959_s0 + $0x2b8] sm:$0xff] }
  0x84   :  { %v221_v19 = vld [vmem:[%s1959_s0 + $0x638] sm:$0xff]  ;;  %v452_v26 = vsel %vm278_vm1, %v109_v16, 0.0 }
  0x85   :  { %v411_v37 = vadd.f32 %v410_v28, %v409_v31  ;;  %v659_v28 = vsel %vm278_vm1, %v210_v17, 0.0  ;;  %v658_v31 = vadd.f32 %v657_v22, %v656_v25  ;;  %v110_v22 = vld [vmem:[%s1959_s0 + $0x2c0] sm:$0xff] }
  0x86   :  { %v222_v25 = vld [vmem:[%s1959_s0 + $0x640] sm:$0xff]  ;;  %v454_v32 = vsel %vm278_vm1, %v110_v22, 0.0 }
  0x87   :  { %v413_v43 = vadd.f32 %v412_v34, %v411_v37  ;;  %v661_v34 = vsel %vm278_vm1, %v211_v23, 0.0  ;;  %v660_v37 = vadd.f32 %v659_v28, %v658_v31  ;;  %v111_v28 = vld [vmem:[%s1959_s0 + $0x2c8] sm:$0xff] }
  0x88   :  { %v223_v31 = vld [vmem:[%s1959_s0 + $0x648] sm:$0xff]  ;;  %v456_v38 = vsel %vm278_vm1, %v111_v28, 0.0 }
  0x89   :  { %v415_v49 = vadd.f32 %v414_v40, %v413_v43  ;;  %v663_v40 = vsel %vm278_vm1, %v212_v29, 0.0  ;;  %v662_v43 = vadd.f32 %v661_v34, %v660_v37  ;;  %v112_v34 = vld [vmem:[%s1959_s0 + $0x2d0] sm:$0xff] }
  0x8a   :  { %v224_v37 = vld [vmem:[%s1959_s0 + $0x650] sm:$0xff]  ;;  %v458_v44 = vsel %vm278_vm1, %v112_v34, 0.0 }
  0x8b   :  { %v417_v55 = vadd.f32 %v416_v46, %v415_v49  ;;  %v665_v46 = vsel %vm278_vm1, %v213_v35, 0.0  ;;  %v664_v49 = vadd.f32 %v663_v40, %v662_v43  ;;  %v113_v40 = vld [vmem:[%s1959_s0 + $0x2d8] sm:$0xff] }
  0x8c   :  { %v225_v43 = vld [vmem:[%s1959_s0 + $0x658] sm:$0xff]  ;;  %v460_v50 = vsel %vm278_vm1, %v113_v40, 0.0 }
  0x8d   :  { %v419_v61 = vadd.f32 %v418_v52, %v417_v55  ;;  %v667_v52 = vsel %vm278_vm1, %v214_v41, 0.0  ;;  %v666_v55 = vadd.f32 %v665_v46, %v664_v49  ;;  %v114_v46 = vld [vmem:[%s1959_s0 + $0x2e0] sm:$0xff] }
  0x8e   :  { %v226_v49 = vld [vmem:[%s1959_s0 + $0x660] sm:$0xff]  ;;  %v462_v56 = vsel %vm278_vm1, %v114_v46, 0.0 }
  0x8f   :  { %v421_v3 = vadd.f32 %v420_v58, %v419_v61  ;;  %v669_v58 = vsel %vm278_vm1, %v215_v47, 0.0  ;;  %v668_v61 = vadd.f32 %v667_v52, %v666_v55  ;;  %v115_v52 = vld [vmem:[%s1959_s0 + $0x2e8] sm:$0xff] }
  0x90   :  { %v227_v55 = vld [vmem:[%s1959_s0 + $0x668] sm:$0xff]  ;;  %v464_v62 = vsel %vm278_vm1, %v115_v52, 0.0 }
  0x91   :  { %v423_v9 = vadd.f32 %v422_v0, %v421_v3  ;;  %v671_v0 = vsel %vm278_vm1, %v216_v53, 0.0  ;;  %v670_v3 = vadd.f32 %v669_v58, %v668_v61  ;;  %v116_v58 = vld [vmem:[%s1959_s0 + $0x2f0] sm:$0xff] }
  0x92   :  { %v228_v61 = vld [vmem:[%s1959_s0 + $0x670] sm:$0xff]  ;;  %v466_v4 = vsel %vm278_vm1, %v116_v58, 0.0 }
  0x93   :  { %v425_v15 = vadd.f32 %v424_v6, %v423_v9  ;;  %v673_v6 = vsel %vm278_vm1, %v217_v59, 0.0  ;;  %v672_v9 = vadd.f32 %v671_v0, %v670_v3  ;;  %v117_v0 = vld [vmem:[%s1959_s0 + $0x2f8] sm:$0xff] }
  0x94   :  { %v229_v3 = vld [vmem:[%s1959_s0 + $0x678] sm:$0xff]  ;;  %v468_v10 = vsel %vm278_vm1, %v117_v0, 0.0 }
  0x95   :  { %v427_v21 = vadd.f32 %v426_v12, %v425_v15  ;;  %v675_v12 = vsel %vm278_vm1, %v218_v1, 0.0  ;;  %v674_v15 = vadd.f32 %v673_v6, %v672_v9  ;;  %v118_v6 = vld [vmem:[%s1959_s0 + $0x300] sm:$0xff] }
  0x96   :  { %v230_v9 = vld [vmem:[%s1959_s0 + $0x680] sm:$0xff]  ;;  %v470_v16 = vsel %vm278_vm1, %v118_v6, 0.0 }
  0x97   :  { %v429_v27 = vadd.f32 %v428_v18, %v427_v21  ;;  %v677_v18 = vsel %vm278_vm1, %v219_v7, 0.0  ;;  %v676_v21 = vadd.f32 %v675_v12, %v674_v15  ;;  %v119_v12 = vld [vmem:[%s1959_s0 + $0x308] sm:$0xff] }
  0x98   :  { %v231_v15 = vld [vmem:[%s1959_s0 + $0x688] sm:$0xff]  ;;  %v472_v22 = vsel %vm278_vm1, %v119_v12, 0.0 }
  0x99   :  { %v431_v33 = vadd.f32 %v430_v24, %v429_v27  ;;  %v679_v24 = vsel %vm278_vm1, %v220_v13, 0.0  ;;  %v678_v27 = vadd.f32 %v677_v18, %v676_v21  ;;  %v120_v18 = vld [vmem:[%s1959_s0 + $0x310] sm:$0xff] }
  0x9a   :  { %v232_v21 = vld [vmem:[%s1959_s0 + $0x690] sm:$0xff]  ;;  %v474_v28 = vsel %vm278_vm1, %v120_v18, 0.0 }
  0x9b   :  { %v433_v39 = vadd.f32 %v432_v30, %v431_v33  ;;  %v681_v30 = vsel %vm278_vm1, %v221_v19, 0.0  ;;  %v680_v33 = vadd.f32 %v679_v24, %v678_v27  ;;  %v121_v24 = vld [vmem:[%s1959_s0 + $0x318] sm:$0xff] }
  0x9c   :  { %v233_v27 = vld [vmem:[%s1959_s0 + $0x698] sm:$0xff]  ;;  %v476_v34 = vsel %vm278_vm1, %v121_v24, 0.0 }
  0x9d   :  { %v435_v45 = vadd.f32 %v434_v36, %v433_v39  ;;  %v683_v36 = vsel %vm278_vm1, %v222_v25, 0.0  ;;  %v682_v39 = vadd.f32 %v681_v30, %v680_v33  ;;  %v122_v30 = vld [vmem:[%s1959_s0 + $0x320] sm:$0xff] }
  0x9e   :  { %v234_v33 = vld [vmem:[%s1959_s0 + $0x6a0] sm:$0xff]  ;;  %v478_v40 = vsel %vm278_vm1, %v122_v30, 0.0 }
  0x9f   :  { %v437_v51 = vadd.f32 %v436_v42, %v435_v45  ;;  %v685_v42 = vsel %vm278_vm1, %v223_v31, 0.0  ;;  %v684_v45 = vadd.f32 %v683_v36, %v682_v39  ;;  %v123_v36 = vld [vmem:[%s1959_s0 + $0x328] sm:$0xff] }
  0xa0   :  { %v235_v39 = vld [vmem:[%s1959_s0 + $0x6a8] sm:$0xff]  ;;  %v480_v46 = vsel %vm278_vm1, %v123_v36, 0.0 }
  0xa1   :  { %v439_v57 = vadd.f32 %v438_v48, %v437_v51  ;;  %v687_v48 = vsel %vm278_vm1, %v224_v37, 0.0  ;;  %v686_v51 = vadd.f32 %v685_v42, %v684_v45  ;;  %v124_v42 = vld [vmem:[%s1959_s0 + $0x330] sm:$0xff] }
  0xa2   :  { %v236_v45 = vld [vmem:[%s1959_s0 + $0x6b0] sm:$0xff]  ;;  %v482_v52 = vsel %vm278_vm1, %v124_v42, 0.0 }
  0xa3   :  { %v441_v63 = vadd.f32 %v440_v54, %v439_v57  ;;  %v689_v54 = vsel %vm278_vm1, %v225_v43, 0.0  ;;  %v688_v57 = vadd.f32 %v687_v48, %v686_v51  ;;  %v125_v48 = vld [vmem:[%s1959_s0 + $0x338] sm:$0xff] }
  0xa4   :  { %v237_v51 = vld [vmem:[%s1959_s0 + $0x6b8] sm:$0xff]  ;;  %v484_v58 = vsel %vm278_vm1, %v125_v48, 0.0 }
  0xa5   :  { %v443_v5 = vadd.f32 %v442_v60, %v441_v63  ;;  %v691_v60 = vsel %vm278_vm1, %v226_v49, 0.0  ;;  %v690_v63 = vadd.f32 %v689_v54, %v688_v57  ;;  %v126_v54 = vld [vmem:[%s1959_s0 + $0x340] sm:$0xff] }
  0xa6   :  { %v238_v57 = vld [vmem:[%s1959_s0 + $0x6c0] sm:$0xff]  ;;  %v486_v0 = vsel %vm278_vm1, %v126_v54, 0.0 }
  0xa7   :  { %v445_v11 = vadd.f32 %v444_v2, %v443_v5  ;;  %v693_v2 = vsel %vm278_vm1, %v227_v55, 0.0  ;;  %v692_v5 = vadd.f32 %v691_v60, %v690_v63  ;;  %v127_v60 = vld [vmem:[%s1959_s0 + $0x348] sm:$0xff] }
  0xa8   :  { %v239_v63 = vld [vmem:[%s1959_s0 + $0x6c8] sm:$0xff]  ;;  %v488_v6 = vsel %vm278_vm1, %v127_v60, 0.0 }
  0xa9   :  { %v447_v17 = vadd.f32 %v446_v8, %v445_v11  ;;  %v695_v8 = vsel %vm278_vm1, %v228_v61, 0.0  ;;  %v694_v11 = vadd.f32 %v693_v2, %v692_v5  ;;  %v128_v2 = vld [vmem:[%s1959_s0 + $0x350] sm:$0xff] }
  0xaa   :  { %v240_v5 = vld [vmem:[%s1959_s0 + $0x6d0] sm:$0xff]  ;;  %v490_v12 = vsel %vm278_vm1, %v128_v2, 0.0 }
  0xab   :  { %v449_v23 = vadd.f32 %v448_v14, %v447_v17  ;;  %v697_v14 = vsel %vm278_vm1, %v229_v3, 0.0  ;;  %v696_v17 = vadd.f32 %v695_v8, %v694_v11  ;;  %v129_v8 = vld [vmem:[%s1959_s0 + $0x358] sm:$0xff] }
  0xac   :  { %v241_v11 = vld [vmem:[%s1959_s0 + $0x6d8] sm:$0xff]  ;;  %v492_v18 = vsel %vm278_vm1, %v129_v8, 0.0 }
  0xad   :  { %v451_v29 = vadd.f32 %v450_v20, %v449_v23  ;;  %v699_v20 = vsel %vm278_vm1, %v230_v9, 0.0  ;;  %v698_v23 = vadd.f32 %v697_v14, %v696_v17  ;;  %v130_v14 = vld [vmem:[%s1959_s0 + $0x360] sm:$0xff] }
  0xae   :  { %v242_v17 = vld [vmem:[%s1959_s0 + $0x6e0] sm:$0xff]  ;;  %v494_v24 = vsel %vm278_vm1, %v130_v14, 0.0 }
  0xaf   :  { %v453_v35 = vadd.f32 %v452_v26, %v451_v29  ;;  %v701_v26 = vsel %vm278_vm1, %v231_v15, 0.0  ;;  %v700_v29 = vadd.f32 %v699_v20, %v698_v23  ;;  %v131_v20 = vld [vmem:[%s1959_s0 + $0x368] sm:$0xff] }
  0xb0   :  { %v243_v23 = vld [vmem:[%s1959_s0 + $0x6e8] sm:$0xff]  ;;  %v496_v30 = vsel %vm278_vm1, %v131_v20, 0.0 }
  0xb1   :  { %v455_v41 = vadd.f32 %v454_v32, %v453_v35  ;;  %v703_v32 = vsel %vm278_vm1, %v232_v21, 0.0  ;;  %v702_v35 = vadd.f32 %v701_v26, %v700_v29  ;;  %v132_v26 = vld [vmem:[%s1959_s0 + $0x370] sm:$0xff] }
  0xb2   :  { %v244_v29 = vld [vmem:[%s1959_s0 + $0x6f0] sm:$0xff]  ;;  %v498_v36 = vsel %vm278_vm1, %v132_v26, 0.0 }
  0xb3   :  { %v457_v47 = vadd.f32 %v456_v38, %v455_v41  ;;  %v705_v38 = vsel %vm278_vm1, %v233_v27, 0.0  ;;  %v704_v41 = vadd.f32 %v703_v32, %v702_v35  ;;  %v133_v32 = vld [vmem:[%s1959_s0 + $0x378] sm:$0xff] }
  0xb4   :  { %v245_v35 = vld [vmem:[%s1959_s0 + $0x6f8] sm:$0xff]  ;;  %v500_v42 = vsel %vm278_vm1, %v133_v32, 0.0  ;;  %v142_v32 = vld [vmem:[%s1959_s0 + $0x3c0] sm:$0xff] }
  0xb5   :  { %v459_v53 = vadd.f32 %v458_v44, %v457_v47  ;;  %v707_v44 = vsel %vm278_vm1, %v234_v33, 0.0  ;;  %v706_v47 = vadd.f32 %v705_v38, %v704_v41  ;;  %v134_v38 = vld [vmem:[%s1959_s0 + $0x380] sm:$0xff] }
  0xb6   :  { %v246_v41 = vld [vmem:[%s1959_s0 + $0x700] sm:$0xff]  ;;  %v502_v48 = vsel %vm278_vm1, %v134_v38, 0.0 }
  0xb7   :  { %v461_v59 = vadd.f32 %v460_v50, %v459_v53  ;;  %v709_v50 = vsel %vm278_vm1, %v235_v39, 0.0  ;;  %v708_v53 = vadd.f32 %v707_v44, %v706_v47  ;;  %v135_v44 = vld [vmem:[%s1959_s0 + $0x388] sm:$0xff] }
  0xb8   :  { %v247_v47 = vld [vmem:[%s1959_s0 + $0x708] sm:$0xff]  ;;  %v504_v54 = vsel %vm278_vm1, %v135_v44, 0.0 }
  0xb9   :  { %v463_v1 = vadd.f32 %v462_v56, %v461_v59  ;;  %v711_v56 = vsel %vm278_vm1, %v236_v45, 0.0  ;;  %v710_v59 = vadd.f32 %v709_v50, %v708_v53  ;;  %v136_v50 = vld [vmem:[%s1959_s0 + $0x390] sm:$0xff] }
  0xba   :  { %v248_v53 = vld [vmem:[%s1959_s0 + $0x710] sm:$0xff]  ;;  %v506_v60 = vsel %vm278_vm1, %v136_v50, 0.0 }
  0xbb   :  { %v465_v7 = vadd.f32 %v464_v62, %v463_v1  ;;  %v713_v62 = vsel %vm278_vm1, %v237_v51, 0.0  ;;  %v712_v1 = vadd.f32 %v711_v56, %v710_v59  ;;  %v137_v56 = vld [vmem:[%s1959_s0 + $0x398] sm:$0xff]  ;;  %v144_v50 = vld [vmem:[%s1959_s0 + $0x3d0] sm:$0xff] }
  0xbc   :  { %v249_v59 = vld [vmem:[%s1959_s0 + $0x718] sm:$0xff]  ;;  %v508_v2 = vsel %vm278_vm1, %v137_v56, 0.0 }
  0xbd   :  { %v467_v13 = vadd.f32 %v466_v4, %v465_v7  ;;  %v715_v4 = vsel %vm278_vm1, %v238_v57, 0.0  ;;  %v714_v7 = vadd.f32 %v713_v62, %v712_v1  ;;  %v138_v62 = vld [vmem:[%s1959_s0 + $0x3a0] sm:$0xff] }
  0xbe   :  { %v250_v1 = vld [vmem:[%s1959_s0 + $0x720] sm:$0xff]  ;;  %v510_v8 = vsel %vm278_vm1, %v138_v62, 0.0 }
  0xbf   :  { %v469_v19 = vadd.f32 %v468_v10, %v467_v13  ;;  %v717_v10 = vsel %vm278_vm1, %v239_v63, 0.0  ;;  %v716_v13 = vadd.f32 %v715_v4, %v714_v7  ;;  %v139_v4 = vld [vmem:[%s1959_s0 + $0x3a8] sm:$0xff] }
  0xc0   :  { %v251_v7 = vld [vmem:[%s1959_s0 + $0x728] sm:$0xff]  ;;  %v512_v14 = vsel %vm278_vm1, %v139_v4, 0.0  ;;  %v146_v4 = vld [vmem:[%s1959_s0 + $0x3e0] sm:$0xff] }
  0xc1   :  { %v471_v25 = vadd.f32 %v470_v16, %v469_v19  ;;  %v719_v16 = vsel %vm278_vm1, %v240_v5, 0.0  ;;  %v718_v19 = vadd.f32 %v717_v10, %v716_v13  ;;  %v252_v13 = vld [vmem:[%s1959_s0 + $0x730] sm:$0xff] }
  0xc3   :  { %v473_v31 = vadd.f32 %v472_v22, %v471_v25  ;;  %v721_v22 = vsel %vm278_vm1, %v241_v11, 0.0  ;;  %v720_v25 = vadd.f32 %v719_v16, %v718_v19  ;;  %v739_v11 = vsel %vm278_vm1, %v250_v1, 0.0 }
  0xc5   :  { %v475_v37 = vadd.f32 %v474_v28, %v473_v31  ;;  %v723_v28 = vsel %vm278_vm1, %v242_v17, 0.0  ;;  %v722_v31 = vadd.f32 %v721_v22, %v720_v25  ;;  %v741_v17 = vsel %vm278_vm1, %v251_v7, 0.0 }
  0xc6   :  { %v743_v22 = vsel %vm278_vm1, %v252_v13, 0.0  ;;  %v147_v13 = vld [vmem:[%s1959_s0 + $0x3e8] sm:$0xff] }
  0xc7   :  { %v477_v43 = vadd.f32 %v476_v34, %v475_v37  ;;  %v725_v34 = vsel %vm278_vm1, %v243_v23, 0.0  ;;  %v724_v37 = vadd.f32 %v723_v28, %v722_v31  ;;  %v141_v23 = vld [vmem:[%s1959_s0 + $0x3b8] sm:$0xff] }
  0xc9   :  { %v479_v49 = vadd.f32 %v478_v40, %v477_v43  ;;  %v727_v40 = vsel %vm278_vm1, %v244_v29, 0.0  ;;  %v726_v43 = vadd.f32 %v725_v34, %v724_v37 }
  0xcb   :  { %v481_v55 = vadd.f32 %v480_v46, %v479_v49  ;;  %v729_v46 = vsel %vm278_vm1, %v245_v35, 0.0  ;;  %v728_v49 = vadd.f32 %v727_v40, %v726_v43 }
  0xcd   :  { %v483_v61 = vadd.f32 %v482_v52, %v481_v55  ;;  %v731_v52 = vsel %vm278_vm1, %v246_v41, 0.0  ;;  %v730_v55 = vadd.f32 %v729_v46, %v728_v49  ;;  %v143_v41 = vld [vmem:[%s1959_s0 + $0x3c8] sm:$0xff] }
  0xcf   :  { %v485_v3 = vadd.f32 %v484_v58, %v483_v61  ;;  %v733_v58 = vsel %vm278_vm1, %v247_v47, 0.0  ;;  %v732_v61 = vadd.f32 %v731_v52, %v730_v55 }
  0xd1   :  { %v487_v9 = vadd.f32 %v486_v0, %v485_v3  ;;  %v735_v0 = vsel %vm278_vm1, %v248_v53, 0.0  ;;  %v734_v3 = vadd.f32 %v733_v58, %v732_v61 }
  0xd3   :  { %v489_v15 = vadd.f32 %v488_v6, %v487_v9  ;;  %v737_v6 = vsel %vm278_vm1, %v249_v59, 0.0  ;;  %v736_v9 = vadd.f32 %v735_v0, %v734_v3  ;;  %v145_v59 = vld [vmem:[%s1959_s0 + $0x3d8] sm:$0xff] }
  0xd5   :  { %v491_v21 = vadd.f32 %v490_v12, %v489_v15  ;;  %v140_v12 = vld [vmem:[%s1959_s0 + $0x3b0] sm:$0xff]  ;;  %v738_v15 = vadd.f32 %v737_v6, %v736_v9 }
  0xd7   :  { %v493_v27 = vadd.f32 %v492_v18, %v491_v21  ;;  %v253_v18 = vld [vmem:[%s1959_s0 + $0x738] sm:$0xff]  ;;  %v740_v19 = vadd.f32 %v739_v11, %v738_v15  ;;  %v514_v21 = vsel %vm278_vm1, %v140_v12, 0.0  ;;  %v526_v11 = vsel %vm278_vm1, %v146_v4, 0.0 }
  0xd8   :  { %v745_v26 = vsel %vm278_vm1, %v253_v18, 0.0 }
  0xd9   :  { %v495_v33 = vadd.f32 %v494_v24, %v493_v27  ;;  %v254_v24 = vld [vmem:[%s1959_s0 + $0x740] sm:$0xff]  ;;  %v742_v25 = vadd.f32 %v741_v17, %v740_v19  ;;  %v255_v27 = vld [vmem:[%s1959_s0 + $0x748] sm:$0xff] }
  0xda   :  { %v747_v31 = vsel %vm278_vm1, %v254_v24, 0.0  ;;  %v749_v35 = vsel %vm278_vm1, %v255_v27, 0.0  ;;  %v267_v17 = vld [vmem:[%s1959_s0 + $0x7a8] sm:$0xff] }
  0xdb   :  { %v497_v39 = vadd.f32 %v496_v30, %v495_v33  ;;  %v744_v29 = vadd.f32 %v743_v22, %v742_v25  ;;  %v516_v30 = vsel %vm278_vm1, %v141_v23, 0.0  ;;  %v256_v33 = vld [vmem:[%s1959_s0 + $0x750] sm:$0xff]  ;;  %v773_v25 = vsel %vm278_vm1, %v267_v17, 0.0 }
  0xdc   :  { %v751_v40 = vsel %vm278_vm1, %v256_v33, 0.0  ;;  %v148_v22 = vld [vmem:[%s1959_s0 + $0x3f0] sm:$0xff] }
  0xdd   :  { %v499_v45 = vadd.f32 %v498_v36, %v497_v39  ;;  %v746_v34 = vadd.f32 %v745_v26, %v744_v29  ;;  %v257_v36 = vld [vmem:[%s1959_s0 + $0x758] sm:$0xff]  ;;  %v518_v39 = vsel %vm278_vm1, %v142_v32, 0.0  ;;  %v268_v23 = vld [vmem:[%s1959_s0 + $0x7b0] sm:$0xff]  ;;  %v530_v29 = vsel %vm278_vm1, %v148_v22, 0.0  ;;  %v270_v32 = vld [vmem:[%s1959_s0 + $0x7c0] sm:$0xff] }
  0xde   :  { %v753_v44 = vsel %vm278_vm1, %v257_v36, 0.0  ;;  %v269_v26 = vld [vmem:[%s1959_s0 + $0x7b8] sm:$0xff] }
  0xdf   :  { %v501_v51 = vadd.f32 %v500_v42, %v499_v45  ;;  %v748_v38 = vadd.f32 %v747_v31, %v746_v34  ;;  %v258_v42 = vld [vmem:[%s1959_s0 + $0x760] sm:$0xff]  ;;  %v259_v45 = vld [vmem:[%s1959_s0 + $0x768] sm:$0xff]  ;;  %v149_v31 = vld [vmem:[%s1959_s0 + $0x3f8] sm:$0xff]  ;;  %v777_v34 = vsel %vm278_vm1, %v269_v26, 0.0 }
  0xe0   :  { %v755_v49 = vsel %vm278_vm1, %v258_v42, 0.0  ;;  %v757_v53 = vsel %vm278_vm1, %v259_v45, 0.0 }
  0xe1   :  { %v503_v57 = vadd.f32 %v502_v48, %v501_v51  ;;  %v750_v43 = vadd.f32 %v749_v35, %v748_v38  ;;  %v520_v48 = vsel %vm278_vm1, %v143_v41, 0.0  ;;  %v260_v51 = vld [vmem:[%s1959_s0 + $0x770] sm:$0xff]  ;;  %v271_v35 = vld [vmem:[%s1959_s0 + $0x7c8] sm:$0xff]  ;;  %v532_v38 = vsel %vm278_vm1, %v149_v31, 0.0 }
  0xe2   :  { %v759_v58 = vsel %vm278_vm1, %v260_v51, 0.0  ;;  %v781_v42 = vsel %vm278_vm1, %v271_v35, 0.0 }
  0xe3   :  { %v505_v63 = vadd.f32 %v504_v54, %v503_v57  ;;  %v752_v47 = vadd.f32 %v751_v40, %v750_v43  ;;  %v261_v54 = vld [vmem:[%s1959_s0 + $0x778] sm:$0xff]  ;;  %v522_v57 = vsel %vm278_vm1, %v144_v50, 0.0  ;;  %v272_v40 = vld [vmem:[%s1959_s0 + $0x7d0] sm:$0xff] }
  0xe4   :  { %v761_v62 = vsel %vm278_vm1, %v261_v54, 0.0  ;;  %v816_v43 = vld [vmem:[%s1960_s1 + $0x18] sm:$0xff] }
  0xe5   :  { %v507_v5 = vadd.f32 %v506_v60, %v505_v63  ;;  %v754_v52 = vadd.f32 %v753_v44, %v752_v47  ;;  %v262_v60 = vld [vmem:[%s1959_s0 + $0x780] sm:$0xff]  ;;  %v263_v63 = vld [vmem:[%s1959_s0 + $0x788] sm:$0xff]  ;;  %v273_v44 = vld [vmem:[%s1959_s0 + $0x7d8] sm:$0xff]  ;;  %836 = vmatpush.msra.mxu0 %v816_v43  ;;  %v783_v47 = vsel %vm278_vm1, %v272_v40, 0.0 }
  0xe6   :  { %v763_v3 = vsel %vm278_vm1, %v262_v60, 0.0  ;;  %v765_v7 = vsel %vm278_vm1, %v263_v63, 0.0  ;;  %v785_v51 = vsel %vm278_vm1, %v273_v44, 0.0 }
  0xe7   :  { %v509_v10 = vadd.f32 %v508_v2, %v507_v5  ;;  %v756_v56 = vadd.f32 %v755_v49, %v754_v52  ;;  %v524_v2 = vsel %vm278_vm1, %v145_v59, 0.0  ;;  %v264_v5 = vld [vmem:[%s1959_s0 + $0x790] sm:$0xff]  ;;  %v274_v49 = vld [vmem:[%s1959_s0 + $0x7e0] sm:$0xff]  ;;  %v814_v52 = vld [vmem:[%s1960_s1 + $0x8] sm:$0xff] }
  0xe8   :  { %v767_v12 = vsel %vm278_vm1, %v264_v5, 0.0 }
  0xe9   :  { %v511_v16 = vadd.f32 %v510_v8, %v509_v10  ;;  %v758_v61 = vadd.f32 %v757_v53, %v756_v56  ;;  %v265_v8 = vld [vmem:[%s1959_s0 + $0x798] sm:$0xff]  ;;  %v275_v53 = vld [vmem:[%s1959_s0 + $0x7e8] sm:$0xff]  ;;  %v787_v56 = vsel %vm278_vm1, %v274_v49, 0.0 }
  0xea   :  { %v789_v60 = vsel %vm278_vm1, %v275_v53, 0.0 }
  0xeb   :  { %v513_v20 = vadd.f32 %v512_v14, %v511_v16  ;;  %v760_v1 = vadd.f32 %v759_v58, %v758_v61  ;;  %v266_v14 = vld [vmem:[%s1959_s0 + $0x7a0] sm:$0xff]  ;;  %v769_v16 = vsel %vm278_vm1, %v265_v8, 0.0  ;;  %v276_v58 = vld [vmem:[%s1959_s0 + $0x7f0] sm:$0xff]  ;;  %v277_v61 = vld [vmem:[%s1959_s0 + $0x7f8] sm:$0xff] }
  0xed   :  { %v515_v28 = vadd.f32 %v514_v21, %v513_v20  ;;  %v762_v6 = vadd.f32 %v761_v62, %v760_v1  ;;  %v528_v20 = vsel %vm278_vm1, %v147_v13, 0.0  ;;  %v771_v21 = vsel %vm278_vm1, %v266_v14, 0.0  ;;  %v21_v14 = vld [vmem:[#allocation2] sm:$0x3] }
  0xef   :  { %v517_v37 = vadd.f32 %v516_v30, %v515_v28  ;;  %v764_v10 = vadd.f32 %v763_v3, %v762_v6  ;;  %v775_v30 = vsel %vm278_vm1, %v268_v23, 0.0 }
  0xf1   :  { %v519_v46 = vadd.f32 %v518_v39, %v517_v37  ;;  %v766_v15 = vadd.f32 %v765_v7, %v764_v10  ;;  %v779_v39 = vsel %vm278_vm1, %v270_v32, 0.0 }
  0xf3   :  { %v521_v55 = vadd.f32 %v520_v48, %v519_v46  ;;  %v768_v19 = vadd.f32 %v767_v12, %v766_v15  ;;  %v815_v48 = vld [vmem:[%s1960_s1 + $0x10] sm:$0xff] }
  0xf4   :  { %837 = vmatpush.msra.mxu0 %v815_v48 }
  0xf5   :  { %v523_v0 = vadd.f32 %v522_v57, %v521_v55  ;;  %v770_v24 = vadd.f32 %v769_v16, %v768_v19  ;;  %v813_v57 = vld [vmem:[%s1960_s1] sm:$0xff] }
  0xf6   :  { %838 = vmatpush.msra.mxu0 %v814_v52  ;;  %v865_v19 = vld [vmem:[%s1961_s2] ss:$0 sm:$0xff] }
  0xf7   :  { %v525_v9 = vadd.f32 %v524_v2, %v523_v0  ;;  %v772_v28 = vadd.f32 %v771_v21, %v770_v24  ;;  %v791_v0 = vsel %vm278_vm1, %v276_v58, 0.0  ;;  %v793_v2 = vsel %vm278_vm1, %v277_v61, 0.0 }
  0xf8   :  { %839 = vmatpush.msra.mxu0 %v813_v57 }
  0xf9   :  { %v527_v18 = vadd.f32 %v526_v11, %v525_v9  ;;  %v774_v33 = vadd.f32 %v773_v25, %v772_v28 }
  0xfb   :  { %v529_v27 = vadd.f32 %v528_v20, %v527_v18  ;;  %v776_v37 = vadd.f32 %v775_v30, %v774_v33 }
  0xfd   :  { %v531_v36 = vadd.f32 %v530_v29, %v529_v27  ;;  %v778_v41 = vadd.f32 %v777_v34, %v776_v37 }
  0xff   :  { %v533_v45 = vadd.f32 %v532_v38, %v531_v36  ;;  %v780_v46 = vadd.f32 %v779_v39, %v778_v41 }
 0x101   :  { %v782_v50 = vadd.f32 %v781_v42, %v780_v46  ;;  %v534_v54 = vrot.slane %v533_v45, 4 }
 0x103   :  { %v784_v55 = vadd.f32 %v783_v47, %v782_v50  ;;  %v535_v62 = vadd.f32 %v534_v54, %v533_v45 }
 0x105   :  { %v786_v59 = vadd.f32 %v785_v51, %v784_v55  ;;  %v536_v3 = vrot.slane %v535_v62, 2 }
 0x107   :  { %v788_v63 = vadd.f32 %v787_v56, %v786_v59  ;;  %v537_v6 = vadd.f32 %v536_v3, %v535_v62 }
 0x109   :  { %v790_v1 = vadd.f32 %v789_v60, %v788_v63  ;;  %v538_v9 = vrot.slane %v537_v6, 1 }
 0x10b   :  { %v792_v4 = vadd.f32 %v791_v0, %v790_v1  ;;  %v539_v12 = vadd.f32 %v538_v9, %v537_v6 }
 0x10d   :  { %v794_v5 = vadd.f32 %v793_v2, %v792_v4 }
 0x10f   :  { %v795_v7 = vrot.slane %v794_v5, 4 }
 0x111   :  { %v796_v8 = vadd.f32 %v795_v7, %v794_v5 }
 0x113   :  { %v797_v10 = vrot.slane %v796_v8, 2 }
 0x115   :  { %v798_v11 = vadd.f32 %v797_v10, %v796_v8 }
 0x117   :  { %v799_v13 = vrot.slane %v798_v11, 1 }
 0x119   :  { %v800_v15 = vadd.f32 %v799_v13, %v798_v11 }
 0x11b   :  { %v804_v16 = vsel %vm803_vm2, %v800_v15, %v539_v12 }
 0x11c   :  { %v806_v17 = vadd.f32 %v804_v16, %v21_v14 }
 0x11e   :  { %808 = vst.msk [vmem:[#allocation2] sm:$0x3] %vm19_vm0, %v806_v17 }
 0x125   :  { %v812_v18 = vld [vmem:[#allocation2] sm:$0x3] }
 0x126   :  { %862 = vmatmul.msk.f32.vlgmr.msra.gmra.mxu0 %vm278_vm1, %v812_v18 }
 0x1a3   :  { %v841_v20 = vpop.f32.mrf.mxu0 }
 0x1a4   :  { %v842_v21 = vadd.f32 %v865_v19, %v841_v20 }
 0x1a6   :  { %845 = vst.msk [vmem:[#allocation3] sm:$0x3] %vm844_vm3, %v842_v21 }
 0x1a7   :  { %856 = dma.vmem_to_hbm [thread:$0]  %s852_s20, 32, %s854_s23, [#allocation4]  }
 0x1a8   :  { %890 = dma.done.wait [#allocation4], 32  }
 0x1a9   :  { %891 = vsyncadd [#allocation4], 4294967264 }
 0x1aa   :  { %861 = vsyncpa [#allocation4], 1 }

</bundles_post_ra>
